<compile_context>
chip_gen: v7x
topology: tpu7x:2x2x1
jax: 0.10.0
libtpu: 0.0.40
codegen_flags: <defaults>
</compile_context>

<pallas_src>
import functools

import jax
import jax.numpy as jnp
from jax.experimental import pallas as pl
from jax.experimental.pallas import tpu as pltpu


def _cdiv(a, b):
    return -(-a // b)


def _tpu_config():
    """(vmem_capacity_bytes, dual_tensorcore) with safe fallbacks."""
    vmem_cap = 128 * 1024 * 1024
    try:
        info = pltpu.get_tpu_info()
        vmem_cap = int(getattr(info, "vmem_capacity_bytes", vmem_cap))
    except Exception:
        pass
    # v7x signature: 64 MiB VMEM per TensorCore and 2 TensorCores per chip;
    # v5e/v6e have 128 MiB VMEM and a single TensorCore.
    dual_tc = vmem_cap <= 64 * 1024 * 1024
    return vmem_cap, dual_tc


def _choose_tp(P, plane_in_bytes, plane_out_bytes, plane_tmp_bytes, sub, budget, dual_tc):
    """Planes per grid step (multiple of `sub`, or the full plane count P)."""
    # Double-buffered I/O blocks + single-buffered in-kernel temporaries.
    per_plane = 2 * (plane_in_bytes + plane_out_bytes) + plane_tmp_bytes
    tp = max(sub, (budget // max(per_plane, 1)) // sub * sub)
    # Keep each input buffer in the <= ~4 MiB streaming sweet spot.
    io_cap = max(sub, ((4 << 20) // max(plane_in_bytes, 1)) // sub * sub)
    tp = min(tp, io_cap)
    if dual_tc:
        # v7x: shard the plane axis over both TensorCores (>= 2 blocks), but only
        # while each per-core block keeps >= ~512 KiB of input so the ~0.35 us/step
        # overhead does not dominate a bandwidth-bound kernel.
        half = _cdiv(_cdiv(P, 2), sub) * sub
        if half * plane_in_bytes >= (512 << 10):
            tp = min(tp, half)
    if tp >= P:
        return P  # single full-extent block (always layout-legal, no padding needed)
    return tp


def _maxpool_s1_k2_kernel(x_ref, o_ref, *, H, W):
    """k=2 fast path. Block = (TP, H*W): each plane lives on the lane axis."""
    x = x_ref[...]                                      # (TP, H*W)
    HW = H * W
    # Single iota; both clamp masks derived from it and kept as bool.
    flat = jax.lax.broadcasted_iota(jnp.int32, x.shape, 1)
    is_last_col = (flat % W) == (W - 1)                 # W power-of-two -> AND
    is_last_row = flat >= (H - 1) * W

    # horizontal window: max(x[h, w], x[h, min(w + 1, W - 1)])
    right = pltpu.roll(x, HW - 1, axis=1)               # right[i] = x[i + 1] (wrap masked)
    m = jnp.maximum(x, jnp.where(is_last_col, x, right))

    # vertical window: max(m[h, w], m[min(h + 1, H - 1), w])
    down = pltpu.roll(m, HW - W, axis=1)                # down[i] = m[i + W] (wrap masked)
    o_ref[...] = jnp.maximum(m, jnp.where(is_last_row, m, down))


def _maxpool1s_general_kernel(x_ref, o_ref, *, k, H, W):
    """General k >= 2 path. Block = (TP, H, W); separable roll+clamp max, then stride k-1."""
    x = x_ref[...]                                      # (TP, H, W)
    s = k - 1

    # column direction (lane axis): m[h, w] = max_dj x[h, min(w + dj, W - 1)]
    col = jax.lax.broadcasted_iota(jnp.int32, x.shape, 2)
    last_col = jnp.broadcast_to(x[:, :, W - 1:W], x.shape)
    m = x
    for dj in range(1, k):
        rolled = pltpu.roll(x, (W - dj) % W, axis=2)    # rolled[..., w] = x[..., w + dj]
        m = jnp.maximum(m, jnp.where(col < W - dj, rolled, last_col))

    # row direction (sublane axis): out[h, w] = max_di m[min(h + di, H - 1), w]
    row = jax.lax.broadcasted_iota(jnp.int32, m.shape, 1)
    last_row = jnp.broadcast_to(m[:, H - 1:H, :], m.shape)
    out = m
    for di in range(1, k):
        rolled = pltpu.roll(m, (H - di) % H, axis=1)    # rolled[:, h] = m[:, h + di]
        out = jnp.maximum(out, jnp.where(row < H - di, rolled, last_row))

    if s > 1:
        out = out[:, ::s, ::s]                          # stride = k - 1 subsample
    o_ref[...] = out


def maxpool1s(x, kernel_size):
    """x: (N, C, H, W) -> (N, C, out_h, out_w), matching MaxPool1s.forward."""
    N, C, H, W = x.shape
    k = int(kernel_size)
    assert k >= 2, "kernel_size must be >= 2 (stride = kernel_size - 1 must be positive)"
    s = k - 1
    out_h = (H - 1) // s + 1
    out_w = (W - 1) // s + 1
    P = N * C
    itemsize = jnp.dtype(x.dtype).itemsize

    vmem_cap, dual_tc = _tpu_config()
    # 128-MiB parts (v5e/v6e): allow big streaming blocks; 64-MiB v7x: leave headroom.
    vmem_limit = 40 * 1024 * 1024 if vmem_cap <= 64 * 1024 * 1024 else 64 * 1024 * 1024
    block_budget = (vmem_limit * 3) // 5   # headroom for Mosaic internal scratch / spills

    compiler_params = pltpu.CompilerParams(
        dimension_semantics=("parallel",),
        vmem_limit_bytes=vmem_limit,
    )

    if k == 2:
        # Lane-dense fast path: planes flattened onto the lane axis (free reshape,
        # no pad / slice HBM round trips; partial tail block handled by Pallas).
        HW = H * W
        sub = max(8, 32 // itemsize)                    # sublane multiple for dtype
        plane_in = HW * itemsize
        plane_out = HW * itemsize
        # Temporaries: ~4 data-width copies (x / shifted / m / result) + int32 iota
        # + 2 masks (counted at 32-bit to stay conservative, incl. bf16-on-v5e casts).
        plane_tmp = 4 * HW * itemsize + 3 * 4 * HW
        tp = _choose_tp(P, plane_in, plane_out, plane_tmp, sub, block_budget, dual_tc)
        grid_steps = _cdiv(P, tp)

        xf = x.reshape(P, HW)
        if grid_steps >= 3 and tp * plane_in < (512 << 10):
            # Small blocks + multi-step grid: deepen input pipelining to hide DMA latency.
            in_spec = pl.BlockSpec((tp, HW), lambda i: (i, 0), pipeline_mode=pl.Buffered(3))
        else:
            in_spec = pl.BlockSpec((tp, HW), lambda i: (i, 0))

        kern = functools.partial(_maxpool_s1_k2_kernel, H=H, W=W)
        out = pl.pallas_call(
            kern,
            out_shape=jax.ShapeDtypeStruct((P, HW), x.dtype),
            grid=(grid_steps,),
            in_specs=[in_spec],
            out_specs=pl.BlockSpec((tp, HW), lambda i: (i, 0)),
            compiler_params=compiler_params,
        )(xf)
        return out.reshape(N, C, H, W)

    # General k > 2 path (rarely used): batched whole-plane (TP, H, W) blocks.
    plane_in = H * W * itemsize
    plane_out = out_h * out_w * itemsize
    plane_tmp = 6 * H * W * itemsize + 8 * H * W
    tp = _choose_tp(P, plane_in, plane_out, plane_tmp, 1, block_budget, dual_tc)
    grid_steps = _cdiv(P, tp)

    xf = x.reshape(P, H, W)
    kern = functools.partial(_maxpool1s_general_kernel, k=k, H=H, W=W)
    out = pl.pallas_call(
        kern,
        out_shape=jax.ShapeDtypeStruct((P, out_h, out_w), x.dtype),
        grid=(grid_steps,),
        in_specs=[pl.BlockSpec((tp, H, W), lambda i: (i, 0, 0))],
        out_specs=pl.BlockSpec((tp, out_h, out_w), lambda i: (i, 0, 0)),
        compiler_params=compiler_params,
    )(xf)
    return out.reshape(N, C, out_h, out_w)


def _reference_maxpool1s(x, kernel_size):
    """Pure-JAX reference mirroring the PyTorch module, for verification."""
    k = kernel_size
    pad = k - 1
    stride = pad
    x_p = jnp.pad(x, ((0, 0), (0, 0), (0, pad), (0, pad)), mode="edge")
    H_p, W_p = x_p.shape[2], x_p.shape[3]
    out_h = (H_p - k) // stride + 1
    out_w = (W_p - k) // stride + 1
    out = None
    for di in range(k):
        for dj in range(k):
            win = x_p[:, :,
                      di:di + (out_h - 1) * stride + 1:stride,
                      dj:dj + (out_w - 1) * stride + 1:stride]
            out = win if out is None else jnp.maximum(out, win)
    return out


if __name__ == "__main__":
    key = jax.random.PRNGKey(0)
    kernel_size = 2  # canonical MaxPool1s(2): stride-1 2x2 max pool, output same H, W

    # Small shape consistent with the module (grid collapses to 1 step).
    x = jax.random.normal(key, (2, 4, 16, 16), dtype=jnp.float32)
    out = jax.block_until_ready(maxpool1s(x, kernel_size))
    ref = _reference_maxpool1s(x, kernel_size)
    assert out.shape == ref.shape, (out.shape, ref.shape)
    assert jnp.allclose(out, ref), "Pallas maxpool1s mismatch vs reference (small)"

    # Larger plane count: exercises the plane-batched path.
    x2 = jax.random.normal(jax.random.PRNGKey(0), (2, 32, 16, 16), dtype=jnp.float32)
    out2 = jax.block_until_ready(maxpool1s(x2, kernel_size))
    ref2 = _reference_maxpool1s(x2, kernel_size)
    assert out2.shape == ref2.shape, (out2.shape, ref2.shape)
    assert jnp.allclose(out2, ref2), "Pallas maxpool1s mismatch vs reference (batched)"

    print("KERNEL_OK")
</pallas_src>

<mosaic_0001>
module attributes {stable_mosaic.version = 11 : i64} {
  func.func @_maxpool_s1_k2_kernel(%arg0: i32, %arg1: memref<8x256xf32, #tpu.memory_space<vmem>>, %arg2: memref<8x256xf32, #tpu.memory_space<vmem>>) attributes {dimension_semantics = [#tpu.dimension_semantics<parallel>], iteration_bounds = array<i64: 1>, scalar_prefetch = 0 : i64, scratch_operands = 0 : i64, tpu.core_type = #tpu.core_type<tc>, window_params = [{transform_indices = @transform_0, window_bounds = array<i64: 8, 256>}, {transform_indices = @transform_1, window_bounds = array<i64: 8, 256>}]} {
    %c0 = arith.constant 0 : index
    %c0_0 = arith.constant 0 : index
    %0 = vector.load %arg1[%c0, %c0_0] : memref<8x256xf32, #tpu.memory_space<vmem>>, vector<8x256xf32>
    %1 = tpu.iota {dimensions = array<i32: 1>} : vector<8x256xi32>
    %c16_i32 = arith.constant 16 : i32
    %c0_i32 = arith.constant 0 : i32
    %2 = arith.cmpi eq, %c16_i32, %c0_i32 : i32
    %c1_i32 = arith.constant 1 : i32
    %3 = arith.select %2, %c1_i32, %c16_i32 : i32
    %4 = vector.broadcast %3 : i32 to vector<8x256xi32>
    %5 = arith.remsi %1, %4 : vector<8x256xi32>
    %c0_i32_1 = arith.constant 0 : i32
    %6 = vector.broadcast %c0_i32_1 : i32 to vector<8x256xi32>
    %7 = arith.cmpi ne, %5, %6 : vector<8x256xi32>
    %c0_i32_2 = arith.constant 0 : i32
    %8 = vector.broadcast %c0_i32_2 : i32 to vector<8x256xi32>
    %9 = arith.cmpi slt, %5, %8 : vector<8x256xi32>
    %c0_i32_3 = arith.constant 0 : i32
    %10 = arith.cmpi slt, %3, %c0_i32_3 : i32
    %11 = vector.broadcast %10 : i1 to vector<8x256xi1>
    %12 = vector.broadcast %11 : vector<8x256xi1> to vector<8x256xi1>
    %13 = arith.xori %9, %12 : vector<8x256xi1>
    %14 = arith.andi %13, %7 : vector<8x256xi1>
    %15 = vector.broadcast %3 : i32 to vector<8x256xi32>
    %16 = arith.addi %5, %15 : vector<8x256xi32>
    %17 = arith.select %14, %16, %5 : vector<8x256xi1>, vector<8x256xi32>
    %c15_i32 = arith.constant 15 : i32
    %18 = vector.broadcast %c15_i32 : i32 to vector<8x256xi32>
    %19 = arith.cmpi eq, %17, %18 : vector<8x256xi32>
    %c240_i32 = arith.constant 240 : i32
    %20 = vector.broadcast %c240_i32 : i32 to vector<8x256xi32>
    %21 = arith.cmpi sge, %1, %20 : vector<8x256xi32>
    %c255_i32 = arith.constant 255 : i32
    %22 = tpu.dynamic_rotate %0 by %c255_i32 dim 1 : vector<8x256xf32>, i32 -> vector<8x256xf32>
    %23 = arith.select %19, %0, %22 : vector<8x256xi1>, vector<8x256xf32>
    %24 = arith.maximumf %0, %23 : vector<8x256xf32>
    %c240_i32_4 = arith.constant 240 : i32
    %25 = tpu.dynamic_rotate %24 by %c240_i32_4 dim 1 : vector<8x256xf32>, i32 -> vector<8x256xf32>
    %26 = arith.select %21, %24, %25 : vector<8x256xi1>, vector<8x256xf32>
    %27 = arith.maximumf %24, %26 : vector<8x256xf32>
    %c0_5 = arith.constant 0 : index
    %c0_6 = arith.constant 0 : index
    %28 = vector.load %arg2[%c0_5, %c0_6] : memref<8x256xf32, #tpu.memory_space<vmem>>, vector<8x256xf32>
    tpu.vector_store %arg2[%c0_5, %c0_6], %27 {strides = array<i32>} : memref<8x256xf32, #tpu.memory_space<vmem>>, vector<8x256xf32>,
    return
  }
  func.func @transform_0(%arg0: i32) -> (i32, i32) {
    %c0_i32 = arith.constant 0 : i32
    %c0_i32_0 = arith.constant 0 : i32
    return %arg0, %c0_i32 : i32, i32
  }
  func.func @transform_1(%arg0: i32) -> (i32, i32) {
    %c0_i32 = arith.constant 0 : i32
    %c0_i32_0 = arith.constant 0 : i32
    return %arg0, %c0_i32 : i32, i32
  }
}

</mosaic_0001>

<bundles_post_ra>
// kernel: tpu_custom_call.1
= control target key start
LH: loop header
LB: loop body
LE: loop exit
PB: predicated region body
PF: predicated region fallthrough
CT: control target
= control target key end

     0   :  { %6 = vsyncpa [#allocation3], 0  ;;  %s183_s0 = inlined_call_operand.hbm [shape: f32[8,256], index: 0, kind: input, shape index: {}]   ;;  %s184_s1 = inlined_call_operand.hbm [shape: f32[8,256], index: 1, kind: output, shape index: {}]  }
   0x1   :  { %7 = vsyncpa [#allocation4], 0  ;;  %s145_s6 = smov [#allocation2]   ;;  %s97_s10 = scalar_lea.hbm %s183_s0, 256 }
   0x2   :  { %s14_s7 = sshll.u32 %s145_s6, 4  ;;  %p98_p0 = scmp.ne.s32.totalorder %s183_s0, %s97_s10  ;;  %s15_s7 = int_to_ptr.vmem [resolvable:$true] %s14_s7 }
   0x3   :  { %p101_p1 = scmp.lt.u32.totalorder %s97_s10, %s183_s0 }
   0x5   :  { %p103_p2 = pnand %p101_p1, %p98_p0 }
   0x7   :  { %106 = shalt.err (!%p103_p2)
}
   0x8   :  { %s107_s15 = scalar_lea.vmem %s15_s7, 256  ;;  %p112_p4 = scmp.lt.s32.totalorder %s15_s7, %s15_s7 }
   0x9   :  { %p108_p3 = scmp.ne.s32.totalorder %s15_s7, %s107_s15  ;;  %p113_p5 = scmp.lt.s32.totalorder %s107_s15, %s107_s15 }
   0xb   :  { %p114_p6 = por %p113_p5, %p112_p4 }
   0xd   :  { %p115_p7 = pnand %p114_p6, %p108_p3 }
   0xf   :  { %118 = shalt.err (!%p115_p7)
}
  0x10   :  { %17 = dma.hbm_to_vmem [thread:$0]  %s183_s0, 256, %s15_s7, [#allocation3]  }
  0x11   :  { %141 = dma.done.wait [#allocation3], 256  }
  0x12   :  { %142 = vsyncadd [#allocation3], 4294967040  ;;  %v21_v0 = vld [vmem:[#allocation2] sm:$0xff]  ;;  %s146_s18 = smov 127   ;;  %v22_v1 = vld [vmem:[#allocation2 + $0x8] sm:$0xff]  ;;  %v23_v2 = vlaneseq  ;;  %s147_s0 = smov 112  }
  0x13   :  { %54 = vrot.lane.b32.xlu0 %v21_v0, %s146_s18  ;;  %s148_s19 = smov [#allocation5]  }
  0x14   :  { %v24_v3 = vand.u32 127, %v23_v2  ;;  %s84_s20 = sshll.u32 %s148_s19, 4  ;;  %s85_s20 = int_to_ptr.vmem [resolvable:$true] %s84_s20 }
  0x15   :  { %s119_s21 = scalar_lea.vmem %s85_s20, 256  ;;  %p124_p9 = scmp.lt.s32.totalorder %s85_s20, %s85_s20 }
  0x16   :  { %v25_v4 = vadd.s32 128, %v24_v3  ;;  %v30_v5 = vand.u32 15, %v24_v3  ;;  %vm58_vm0 = vcmp.lt.s32.totalorder %v24_v3, 127  ;;  %vm69_vm3 = vcmp.lt.s32.totalorder %v24_v3, 112  ;;  %p120_p8 = scmp.ne.s32.totalorder %s85_s20, %s119_s21  ;;  %p125_p10 = scmp.lt.s32.totalorder %s119_s21, %s119_s21 }
  0x17   :  { %56 = vrot.lane.b32.xlu0 %v22_v1, %s146_s18 }
  0x18   :  { %v37_v7 = vand.u32 15, %v25_v4  ;;  %vm50_vm1 = vcmp.eq.s32.totalorder %v30_v5, 15  ;;  %vm53_vm4 = vcmp.ge.s32.totalorder %v25_v4, 240  ;;  %p126_p11 = por %p125_p10, %p124_p9 }
  0x1a   :  { %vm51_vm2 = vcmp.eq.s32.totalorder %v37_v7, 15  ;;  %p127_p12 = pnand %p126_p11, %p120_p8 }
  0x85   :  { %v55_v6 = vpop.permute.xlu0 %54 }
  0x89   :  { %v57_v8 = vpop.permute.xlu0 %56 }
  0x8a   :  { %v59_v9 = vsel %vm58_vm0, %v55_v6, %v57_v8  ;;  %v60_v10 = vsel %vm58_vm0, %v57_v8, %v55_v6 }
  0x8b   :  { %v61_v11 = vsel %vm50_vm1, %v21_v0, %v59_v9  ;;  %v62_v13 = vsel %vm51_vm2, %v22_v1, %v60_v10 }
  0x8c   :  { %v63_v12 = vmax.f32 %v21_v0, %v61_v11  ;;  %v64_v14 = vmax.f32 %v22_v1, %v62_v13 }
  0x8e   :  { %65 = vrot.lane.b32.xlu1 %v63_v12, %s147_s0 }
  0x92   :  { %67 = vrot.lane.b32.xlu1 %v64_v14, %s147_s0 }
 0x100   :  { %v66_v15 = vpop.permute.xlu1 %65 }
 0x104   :  { %v68_v16 = vpop.permute.xlu1 %67 }
 0x105   :  { %v70_v17 = vsel %vm69_vm3, %v66_v15, %v68_v16  ;;  %v71_v18 = vsel %vm69_vm3, %v68_v16, %v66_v15 }
 0x106   :  { %v73_v19 = vsel %vm53_vm4, %v64_v14, %v71_v18  ;;  %v74_v20 = vmax.f32 %v63_v12, %v70_v17 }
 0x107   :  { %v75_v21 = vmax.f32 %v64_v14, %v73_v19 }
 0x108   :  { %76 = vst [vmem:[#allocation5] sm:$0xff] %v74_v20 }
 0x109   :  { %77 = vst [vmem:[#allocation5 + $0x8] sm:$0xff] %v75_v21 }
 0x10a   :  { %130 = shalt.err (!%p127_p12)
}
 0x10b   :  { %s131_s24 = scalar_lea.hbm %s184_s1, 256 }
 0x10c   :  { %p132_p13 = scmp.ne.s32.totalorder %s184_s1, %s131_s24  ;;  %p135_p0 = scmp.lt.u32.totalorder %s131_s24, %s184_s1 }
 0x10e   :  { %p137_p1 = pnand %p135_p0, %p132_p13 }
 0x110   :  { %140 = shalt.err (!%p137_p1)
}
 0x111   :  { %87 = dma.vmem_to_hbm [thread:$0]  %s85_s20, 256, %s184_s1, [#allocation4]  }
 0x112   :  { %143 = dma.done.wait [#allocation4], 256  }
 0x113   :  { %144 = vsyncadd [#allocation4], 4294967040 }
 0x114   :  { %91 = vsyncpa [#allocation3], 1 }
 0x115   :  { %92 = vsyncpa [#allocation4], 1 }

</bundles_post_ra>
